<compile_context>
chip_gen: v6e
topology: v6e:2x2x1
jax: 0.10.0
libtpu: 0.0.40
codegen_flags: <defaults>
</compile_context>

<pallas_src>
import functools
import math

import jax
import jax.numpy as jnp
from jax.experimental import pallas as pl
from jax.experimental.pallas import tpu as pltpu


def _ln_kernel_direct(x_ref, w_ref, b_ref, o_ref, *, eps, c):
    """LayerNorm tile where one kernel row == one logical row (width C)."""
    x = x_ref[...].astype(jnp.float32)                       # (tm, C)
    inv_c = 1.0 / c
    s1 = jnp.sum(x, axis=-1, keepdims=True)                  # (tm, 1)
    s2 = jnp.sum(x * x, axis=-1, keepdims=True)              # (tm, 1)
    mu = s1 * inv_c
    var = jnp.maximum(s2 * inv_c - mu * mu, 0.0)
    inv = jax.lax.rsqrt(var + eps)                           # (tm, 1)  EUP
    w = w_ref[...].astype(jnp.float32)                       # (1, C)
    b = b_ref[...].astype(jnp.float32)                       # (1, C)
    o_ref[...] = ((x - mu) * (inv * w) + b).astype(o_ref.dtype)


def _ln_kernel_packed(x_ref, w_ref, b_ref, sf_ref, sb_ref, o_ref, *, eps, c):
    """LayerNorm tile where each kernel row packs k logical rows (width W = k*C)."""
    x = x_ref[...].astype(jnp.float32)                       # (tm, W), lane-dense
    sf = sf_ref[...]                                         # (W, k) segment indicator
    sb = sb_ref[...]                                         # (k, W) == sf.T
    inv_c = 1.0 / c
    # per-segment (i.e. per logical row) sums via tiny MXU matmuls
    s1 = jnp.dot(x, sf, preferred_element_type=jnp.float32)      # (tm, k)
    s2 = jnp.dot(x * x, sf, preferred_element_type=jnp.float32)  # (tm, k)
    mu = s1 * inv_c
    var = jnp.maximum(s2 * inv_c - mu * mu, 0.0)
    inv = jax.lax.rsqrt(var + eps)                           # (tm, k)  EUP
    # broadcast per-segment scalars back across their C lanes (MXU, otherwise idle)
    mu_f = jnp.dot(mu, sb, preferred_element_type=jnp.float32)    # (tm, W)
    inv_f = jnp.dot(inv, sb, preferred_element_type=jnp.float32)  # (tm, W)
    w = w_ref[...].astype(jnp.float32)                       # (1, W) = weight tiled k times
    b = b_ref[...].astype(jnp.float32)                       # (1, W)
    o_ref[...] = ((x - mu_f) * (inv_f * w) + b).astype(o_ref.dtype)


def with_bias_layernorm(x, weight, bias, *, eps=1e-5, tile_rows=None,
                        target_tile_bytes=2 * 1024 * 1024):
    """x: (..., C); weight, bias: (C,). Normalizes over the last dim (PyTorch semantics)."""
    orig_shape = x.shape
    C = orig_shape[-1]
    M = 1
    for d in orig_shape[:-1]:
        M *= d
    x2 = x.reshape(M, C)
    itemsize = jnp.dtype(x.dtype).itemsize

    # Lane-dense repack: view k consecutive rows as one kernel row of width W = k*C,
    # a multiple of 128.  Pure row-major metadata reshape, no extra HBM traffic.
    if C % 128 == 0:
        k = 1
    else:
        k = math.lcm(C, 128) // C                 # == 128 // gcd(C, 128)
        # fall back (correct, just not lane-dense) if rows don't pack evenly or the
        # resident indicator constants (2 * W * k f32) would get large.
        if (M % k) != 0 or (2 * k * C * k * 4) > (2 * 1024 * 1024):
            k = 1
    W = k * C
    Mg = M // k
    xg = x2.reshape(Mg, W)

    # Row-tile size: big enough to amortize per-grid-step overhead (~2 MiB of input),
    # multiple of the sublane packing, small enough that double-buffered in+out tiles
    # stay far under default scoped VMEM on every chip (v5e 16 MiB ... v7x 32 MiB),
    # and the grid keeps several steps for megacore sharding.
    align = max(8, 32 // max(1, itemsize))        # 8 f32, 16 bf16, 32 int8
    if tile_rows is None:
        tm = max(1, target_tile_bytes // (W * itemsize))
        tm = max(align, (tm // align) * align)
        tm = min(tm, 4096)
    else:
        tm = max(align, ((tile_rows + align - 1) // align) * align)
    if tm >= Mg:
        tm = Mg                                   # block == full array dim (always legal)
    grid = (pl.cdiv(Mg, tm),)                     # partial last block handled by Pallas

    w_row = (jnp.tile(weight, k) if k > 1 else weight).reshape(1, W)
    b_row = (jnp.tile(bias, k) if k > 1 else bias).reshape(1, W)

    out_shape = jax.ShapeDtypeStruct((Mg, W), x.dtype)
    compiler_params = pltpu.CompilerParams(dimension_semantics=("parallel",))

    if k == 1:
        out = pl.pallas_call(
            functools.partial(_ln_kernel_direct, eps=eps, c=C),
            out_shape=out_shape,
            grid_spec=pltpu.PrefetchScalarGridSpec(
                num_scalar_prefetch=0,
                grid=grid,
                in_specs=[
                    pl.BlockSpec((tm, W), lambda i: (i, 0)),
                    pl.BlockSpec((1, W), lambda i: (0, 0)),
                    pl.BlockSpec((1, W), lambda i: (0, 0)),
                ],
                out_specs=pl.BlockSpec((tm, W), lambda i: (i, 0)),
            ),
            compiler_params=compiler_params,
        )(xg, w_row, b_row)
    else:
        # tiny constant segment-indicator matrices (resident across the whole grid)
        seg = jnp.repeat(jnp.arange(k, dtype=jnp.int32), C)                    # (W,)
        sfwd = (seg[:, None] == jnp.arange(k, dtype=jnp.int32)[None, :]
                ).astype(jnp.float32)                                          # (W, k)
        sbwd = sfwd.T                                                          # (k, W)
        out = pl.pallas_call(
            functools.partial(_ln_kernel_packed, eps=eps, c=C),
            out_shape=out_shape,
            grid_spec=pltpu.PrefetchScalarGridSpec(
                num_scalar_prefetch=0,
                grid=grid,
                in_specs=[
                    pl.BlockSpec((tm, W), lambda i: (i, 0)),
                    pl.BlockSpec((1, W), lambda i: (0, 0)),
                    pl.BlockSpec((1, W), lambda i: (0, 0)),
                    pl.BlockSpec((W, k), lambda i: (0, 0)),
                    pl.BlockSpec((k, W), lambda i: (0, 0)),
                ],
                out_specs=pl.BlockSpec((tm, W), lambda i: (i, 0)),
            ),
            compiler_params=compiler_params,
        )(xg, w_row, b_row, sfwd, sbwd)

    return out.reshape(orig_shape)


def _ref_layernorm(x, w, b, eps=1e-5):
    x32 = x.astype(jnp.float32)
    mu = jnp.mean(x32, axis=-1, keepdims=True)
    var = jnp.mean((x32 - mu) ** 2, axis=-1, keepdims=True)
    y = (x32 - mu) / jnp.sqrt(var + eps) * w.astype(jnp.float32) + b.astype(jnp.float32)
    return y.astype(x.dtype)


if __name__ == "__main__":
    key = jax.random.PRNGKey(0)
    kx, kx2, kw, kb = jax.random.split(key, 4)

    # (batch, seq, hidden) — normalize over hidden (last dim), as the PyTorch module does.
    B, S, C = 2, 8, 32
    x = jax.random.normal(kx, (B, S, C), dtype=jnp.float32)
    weight = 1.0 + 0.1 * jax.random.normal(kw, (C,), dtype=jnp.float32)
    bias = 0.1 * jax.random.normal(kb, (C,), dtype=jnp.float32)

    # case 1: lane-dense packed path (C=32 -> k=4, kernel rows of width 128)
    y = jax.block_until_ready(with_bias_layernorm(x, weight, bias))
    ref = _ref_layernorm(x, weight, bias)
    assert jnp.max(jnp.abs(y - ref)) < 1e-4, "mismatch vs reference (packed path)"

    # case 2: row count not divisible by the tile -> cdiv grid with a partial last block
    # (no wrapper padding / slicing anywhere), direct-kernel fallback path.
    x2 = jax.random.normal(kx2, (3, 7, C), dtype=jnp.float32)
    y2 = jax.block_until_ready(with_bias_layernorm(x2, weight, bias, tile_rows=8))
    ref2 = _ref_layernorm(x2, weight, bias)
    assert jnp.max(jnp.abs(y2 - ref2)) < 1e-4, "mismatch vs reference (partial-block path)"

    print("KERNEL_OK")
</pallas_src>

<mosaic_0001>
module attributes {stable_mosaic.version = 11 : i64} {
  func.func @_ln_kernel_packed(%arg0: i32, %arg1: memref<4x128xf32, #tpu.memory_space<vmem>>, %arg2: memref<1x128xf32, #tpu.memory_space<vmem>>, %arg3: memref<1x128xf32, #tpu.memory_space<vmem>>, %arg4: memref<128x4xf32, #tpu.memory_space<vmem>>, %arg5: memref<4x128xf32, #tpu.memory_space<vmem>>, %arg6: memref<4x128xf32, #tpu.memory_space<vmem>>) attributes {dimension_semantics = [#tpu.dimension_semantics<parallel>], iteration_bounds = array<i64: 1>, scalar_prefetch = 0 : i64, scratch_operands = 0 : i64, tpu.core_type = #tpu.core_type<tc>, window_params = [{transform_indices = @transform_0, window_bounds = array<i64: 4, 128>}, {pipeline_mode = #tpu.pipeline_mode<synchronous>, transform_indices = @transform_1, window_bounds = array<i64: 1, 128>}, {pipeline_mode = #tpu.pipeline_mode<synchronous>, transform_indices = @transform_2, window_bounds = array<i64: 1, 128>}, {pipeline_mode = #tpu.pipeline_mode<synchronous>, transform_indices = @transform_3, window_bounds = array<i64: 128, 4>}, {pipeline_mode = #tpu.pipeline_mode<synchronous>, transform_indices = @transform_4, window_bounds = array<i64: 4, 128>}, {transform_indices = @transform_5, window_bounds = array<i64: 4, 128>}]} {
    %c0 = arith.constant 0 : index
    %c0_0 = arith.constant 0 : index
    %0 = vector.load %arg1[%c0, %c0_0] : memref<4x128xf32, #tpu.memory_space<vmem>>, vector<4x128xf32>
    %c0_1 = arith.constant 0 : index
    %c0_2 = arith.constant 0 : index
    %1 = vector.load %arg4[%c0_1, %c0_2] : memref<128x4xf32, #tpu.memory_space<vmem>>, vector<128x4xf32>
    %c0_3 = arith.constant 0 : index
    %c0_4 = arith.constant 0 : index
    %2 = vector.load %arg5[%c0_3, %c0_4] : memref<4x128xf32, #tpu.memory_space<vmem>>, vector<4x128xf32>
    %cst = arith.constant dense<0.000000e+00> : vector<4x4xf32>
    %3 = tpu.matmul %0, %1, %cst {dimension_numbers = #tpu.dot_dimension_numbers<[1], [0], [0], [1], [0, 0, 1, 1], [], []>} : vector<4x128xf32>, vector<128x4xf32>, vector<4x4xf32> -> vector<4x4xf32>
    %4 = arith.mulf %0, %0 : vector<4x128xf32>
    %cst_5 = arith.constant dense<0.000000e+00> : vector<4x4xf32>
    %5 = tpu.matmul %4, %1, %cst_5 {dimension_numbers = #tpu.dot_dimension_numbers<[1], [0], [0], [1], [0, 0, 1, 1], [], []>} : vector<4x128xf32>, vector<128x4xf32>, vector<4x4xf32> -> vector<4x4xf32>
    %cst_6 = arith.constant 3.125000e-02 : f32
    %6 = vector.broadcast %cst_6 : f32 to vector<4x4xf32>
    %7 = arith.mulf %3, %6 : vector<4x4xf32>
    %cst_7 = arith.constant 3.125000e-02 : f32
    %8 = vector.broadcast %cst_7 : f32 to vector<4x4xf32>
    %9 = arith.mulf %5, %8 : vector<4x4xf32>
    %10 = arith.mulf %7, %7 : vector<4x4xf32>
    %11 = arith.subf %9, %10 : vector<4x4xf32>
    %cst_8 = arith.constant 0.000000e+00 : f32
    %12 = vector.broadcast %cst_8 : f32 to vector<4x4xf32>
    %13 = arith.maximumf %11, %12 : vector<4x4xf32>
    %cst_9 = arith.constant 9.99999974E-6 : f32
    %14 = vector.broadcast %cst_9 : f32 to vector<4x4xf32>
    %15 = arith.addf %13, %14 : vector<4x4xf32>
    %16 = math.rsqrt %15 : vector<4x4xf32>
    %cst_10 = arith.constant dense<0.000000e+00> : vector<4x128xf32>
    %17 = tpu.matmul %7, %2, %cst_10 {dimension_numbers = #tpu.dot_dimension_numbers<[1], [0], [0], [1], [0, 0, 1, 1], [], []>} : vector<4x4xf32>, vector<4x128xf32>, vector<4x128xf32> -> vector<4x128xf32>
    %cst_11 = arith.constant dense<0.000000e+00> : vector<4x128xf32>
    %18 = tpu.matmul %16, %2, %cst_11 {dimension_numbers = #tpu.dot_dimension_numbers<[1], [0], [0], [1], [0, 0, 1, 1], [], []>} : vector<4x4xf32>, vector<4x128xf32>, vector<4x128xf32> -> vector<4x128xf32>
    %c0_12 = arith.constant 0 : index
    %c0_13 = arith.constant 0 : index
    %19 = vector.load %arg2[%c0_12, %c0_13] : memref<1x128xf32, #tpu.memory_space<vmem>>, vector<1x128xf32>
    %c0_14 = arith.constant 0 : index
    %c0_15 = arith.constant 0 : index
    %20 = vector.load %arg3[%c0_14, %c0_15] : memref<1x128xf32, #tpu.memory_space<vmem>>, vector<1x128xf32>
    %21 = arith.subf %0, %17 : vector<4x128xf32>
    %22 = vector.broadcast %19 : vector<1x128xf32> to vector<4x128xf32>
    %23 = arith.mulf %18, %22 : vector<4x128xf32>
    %24 = arith.mulf %21, %23 : vector<4x128xf32>
    %25 = vector.broadcast %20 : vector<1x128xf32> to vector<4x128xf32>
    %26 = arith.addf %24, %25 : vector<4x128xf32>
    %c0_16 = arith.constant 0 : index
    %c0_17 = arith.constant 0 : index
    %27 = vector.load %arg6[%c0_16, %c0_17] : memref<4x128xf32, #tpu.memory_space<vmem>>, vector<4x128xf32>
    tpu.vector_store %arg6[%c0_16, %c0_17], %26 {strides = array<i32>} : memref<4x128xf32, #tpu.memory_space<vmem>>, vector<4x128xf32>,
    return
  }
  func.func @transform_0(%arg0: i32) -> (i32, i32) {
    %c0_i32 = arith.constant 0 : i32
    %c0_i32_0 = arith.constant 0 : i32
    return %arg0, %c0_i32 : i32, i32
  }
  func.func @transform_1(%arg0: i32) -> (i32, i32) {
    %c0_i32 = arith.constant 0 : i32
    %c0_i32_0 = arith.constant 0 : i32
    %c0_i32_1 = arith.constant 0 : i32
    return %c0_i32, %c0_i32_0 : i32, i32
  }
  func.func @transform_2(%arg0: i32) -> (i32, i32) {
    %c0_i32 = arith.constant 0 : i32
    %c0_i32_0 = arith.constant 0 : i32
    %c0_i32_1 = arith.constant 0 : i32
    return %c0_i32, %c0_i32_0 : i32, i32
  }
  func.func @transform_3(%arg0: i32) -> (i32, i32) {
    %c0_i32 = arith.constant 0 : i32
    %c0_i32_0 = arith.constant 0 : i32
    %c0_i32_1 = arith.constant 0 : i32
    return %c0_i32, %c0_i32_0 : i32, i32
  }
  func.func @transform_4(%arg0: i32) -> (i32, i32) {
    %c0_i32 = arith.constant 0 : i32
    %c0_i32_0 = arith.constant 0 : i32
    %c0_i32_1 = arith.constant 0 : i32
    return %c0_i32, %c0_i32_0 : i32, i32
  }
  func.func @transform_5(%arg0: i32) -> (i32, i32) {
    %c0_i32 = arith.constant 0 : i32
    %c0_i32_0 = arith.constant 0 : i32
    return %arg0, %c0_i32 : i32, i32
  }
}

</mosaic_0001>

<bundles_post_ra>
// kernel: tpu_custom_call.1
= control target key start
LH: loop header
LB: loop body
LE: loop exit
PB: predicated region body
PF: predicated region fallthrough
CT: control target
= control target key end

     0   :  { %v522_v1 = vmov 0.0   ;;  %s656_s0 = inlined_call_operand.vmem [shape: f32[4,128], index: 0, kind: input, shape index: {}]   ;;  %s657_s1 = inlined_call_operand.vmem [shape: f32[1,128], index: 1, kind: input, shape index: {}]   ;;  %s658_s2 = inlined_call_operand.vmem [shape: f32[1,128], index: 2, kind: input, shape index: {}]   ;;  %s659_s3 = inlined_call_operand.vmem [shape: f32[128,4], index: 3, kind: input, shape index: {}]   ;;  %s660_s4 = inlined_call_operand.vmem [shape: f32[4,128], index: 4, kind: input, shape index: {}]   ;;  %s661_s5 = inlined_call_operand.hbm [shape: f32[4,128], index: 5, kind: output, shape index: {}]  }
   0x1   :  { %v37_v0 = vld [vmem:[%s659_s3 + $0x78] sm:$0xff]  ;;  %415 = vmatprep.subr.mxu0 %v522_v1  ;;  %450 = vmatprep.subr.mxu1 %v522_v1  ;;  %v36_v2 = vld [vmem:[%s659_s3 + $0x70] sm:$0xff]  ;;  %v35_v3 = vld [vmem:[%s659_s3 + $0x68] sm:$0xff] }
   0x2   :  { %416 = vmatpush3.msra.mxu0 %v37_v0  ;;  %451 = vmatpush3.msra.mxu1 %v37_v0  ;;  %v34_v4 = vld [vmem:[%s659_s3 + $0x60] sm:$0xff] }
   0x3   :  { %417 = vmatprep.subr.mxu0 %v522_v1  ;;  %452 = vmatprep.subr.mxu1 %v522_v1 }
   0x4   :  { %418 = vmatpush3.msra.mxu0 %v36_v2  ;;  %453 = vmatpush3.msra.mxu1 %v36_v2 }
   0x5   :  { %419 = vmatprep.subr.mxu0 %v522_v1  ;;  %454 = vmatprep.subr.mxu1 %v522_v1 }
   0x6   :  { %10 = vsyncpa [#allocation3], 0  ;;  %420 = vmatpush3.msra.mxu0 %v35_v3  ;;  %455 = vmatpush3.msra.mxu1 %v35_v3  ;;  %v33_v5 = vld [vmem:[%s659_s3 + $0x58] sm:$0xff]  ;;  %v32_v6 = vld [vmem:[%s659_s3 + $0x50] sm:$0xff]  ;;  %vm523_vm0 = vmmov 0   ;;  %vm191_vm1 = vcmask 1043456  }
   0x7   :  { %421 = vmatprep.subr.mxu0 %v522_v1  ;;  %456 = vmatprep.subr.mxu1 %v522_v1  ;;  %v31_v7 = vld [vmem:[%s659_s3 + $0x48] sm:$0xff]  ;;  %v30_v8 = vld [vmem:[%s659_s3 + $0x40] sm:$0xff]  ;;  %v29_v9 = vld [vmem:[%s659_s3 + $0x38] sm:$0xff]  ;;  %vm187_vm2 = vcmask 31744   ;;  %s524_s30 = smov [#allocation2]  }
   0x8   :  { %422 = vmatpush3.msra.mxu0 %v34_v4  ;;  %457 = vmatpush3.msra.mxu1 %v34_v4  ;;  %v28_v10 = vld [vmem:[%s659_s3 + $0x30] sm:$0xff]  ;;  %v27_v11 = vld [vmem:[%s659_s3 + $0x28] sm:$0xff]  ;;  %v26_v12 = vld [vmem:[%s659_s3 + $0x20] sm:$0xff]  ;;  %s363_s6 = sshll.u32 %s524_s30, 4  ;;  %s364_s6 = int_to_ptr.vmem [resolvable:$true] %s363_s6 }
   0x9   :  { %423 = vmatprep.subr.mxu0 %v522_v1  ;;  %458 = vmatprep.subr.mxu1 %v522_v1  ;;  %v25_v13 = vld [vmem:[%s659_s3 + $0x18] sm:$0xff]  ;;  %v24_v14 = vld [vmem:[%s659_s3 + $0x10] sm:$0xff]  ;;  %v23_v15 = vld [vmem:[%s659_s3 + $0x8] sm:$0xff]  ;;  %s500_s7 = scalar_lea.vmem %s364_s6, 64  ;;  %p505_p1 = scmp.lt.s32.totalorder %s364_s6, %s364_s6 }
   0xa   :  { %424 = vmatpush3.msra.mxu0 %v33_v5  ;;  %459 = vmatpush3.msra.mxu1 %v33_v5  ;;  %v21_v16 = vld [vmem:[%s656_s0] sm:$0xf]  ;;  %p501_p0 = scmp.ne.s32.totalorder %s364_s6, %s500_s7  ;;  %p506_p2 = scmp.lt.s32.totalorder %s500_s7, %s500_s7 }
   0xb   :  { %425 = vmatprep.subr.mxu0 %v522_v1  ;;  %460 = vmatprep.subr.mxu1 %v522_v1  ;;  %v22_v17 = vld [vmem:[%s659_s3] sm:$0xff]  ;;  %v109_v18 = vmul.f32 %v21_v16, %v21_v16 }
   0xc   :  { %426 = vmatpush3.msra.mxu0 %v32_v6  ;;  %461 = vmatpush3.msra.mxu1 %v32_v6  ;;  %v38_v19 = vld [vmem:[%s660_s4] sm:$0xf]  ;;  %p507_p3 = por %p506_p2, %p505_p1 }
   0xd   :  { %427 = vmatprep.subr.mxu0 %v522_v1  ;;  %462 = vmatprep.subr.mxu1 %v522_v1  ;;  %v375_v33 = vld [vmem:[%s657_s1] ss:$0 sm:$0xff] }
   0xe   :  { %428 = vmatpush3.msra.mxu0 %v31_v7  ;;  %463 = vmatpush3.msra.mxu1 %v31_v7  ;;  %v376_v38 = vld [vmem:[%s658_s2] ss:$0 sm:$0xff]  ;;  %p508_p4 = pnand %p507_p3, %p501_p0 }
   0xf   :  { %429 = vmatprep.subr.mxu0 %v522_v1  ;;  %464 = vmatprep.subr.mxu1 %v522_v1 }
  0x10   :  { %430 = vmatpush3.msra.mxu0 %v30_v8  ;;  %465 = vmatpush3.msra.mxu1 %v30_v8 }
  0x11   :  { %431 = vmatprep.subr.mxu0 %v522_v1  ;;  %466 = vmatprep.subr.mxu1 %v522_v1 }
  0x12   :  { %432 = vmatpush3.msra.mxu0 %v29_v9  ;;  %467 = vmatpush3.msra.mxu1 %v29_v9 }
  0x13   :  { %433 = vmatprep.subr.mxu0 %v522_v1  ;;  %468 = vmatprep.subr.mxu1 %v522_v1 }
  0x14   :  { %434 = vmatpush3.msra.mxu0 %v28_v10  ;;  %469 = vmatpush3.msra.mxu1 %v28_v10 }
  0x15   :  { %435 = vmatprep.subr.mxu0 %v522_v1  ;;  %470 = vmatprep.subr.mxu1 %v522_v1 }
  0x16   :  { %436 = vmatpush3.msra.mxu0 %v27_v11  ;;  %471 = vmatpush3.msra.mxu1 %v27_v11 }
  0x17   :  { %437 = vmatprep.subr.mxu0 %v522_v1  ;;  %472 = vmatprep.subr.mxu1 %v522_v1 }
  0x18   :  { %438 = vmatpush3.msra.mxu0 %v26_v12  ;;  %473 = vmatpush3.msra.mxu1 %v26_v12 }
  0x19   :  { %439 = vmatprep.subr.mxu0 %v522_v1  ;;  %474 = vmatprep.subr.mxu1 %v522_v1 }
  0x1a   :  { %440 = vmatpush3.msra.mxu0 %v25_v13  ;;  %475 = vmatpush3.msra.mxu1 %v25_v13 }
  0x1b   :  { %441 = vmatprep.subr.mxu0 %v522_v1  ;;  %476 = vmatprep.subr.mxu1 %v522_v1 }
  0x1c   :  { %442 = vmatpush3.msra.mxu0 %v24_v14  ;;  %477 = vmatpush3.msra.mxu1 %v24_v14 }
  0x1d   :  { %443 = vmatprep.subr.mxu0 %v522_v1  ;;  %478 = vmatprep.subr.mxu1 %v522_v1 }
  0x1e   :  { %444 = vmatpush3.msra.mxu0 %v23_v15  ;;  %479 = vmatpush3.msra.mxu1 %v23_v15 }
  0x1f   :  { %445 = vmatprep.subr.mxu0 %v522_v1  ;;  %480 = vmatprep.subr.mxu1 %v522_v1 }
  0x20   :  { %446 = vmatpush3.msra.mxu0 %v22_v17  ;;  %447 = vmatprep.mubr.msk.f32.mxu0 %vm523_vm0, %v522_v1 }
  0x21   :  { %481 = vmatpush3.msra.mxu1 %v22_v17  ;;  %482 = vmatprep.mubr.msk.f32.mxu1 %vm523_vm0, %v522_v1 }
  0x22   :  { %448 = vmatmul.mubr.f32.vlgmr.msra.gmra.mxu0 %v21_v16  ;;  %483 = vmatmul.mubr.f32.vlgmr.msra.gmra.mxu1 %v109_v18 }
  0x23   :  { %485 = vmatprep.subr.mxu0 %v522_v1  ;;  %487 = vmatprep.mubr.msk.f32.mxu0 %vm523_vm0, %v522_v1 }
  0x24   :  { %490 = vmatprep.subr.mxu1 %v522_v1  ;;  %492 = vmatprep.mubr.msk.f32.mxu1 %vm523_vm0, %v522_v1 }
  0x25   :  { %486 = vmatpush3.msk.msra.mxu0 %vm191_vm1, %v38_v19  ;;  %491 = vmatpush3.msk.msra.mxu1 %vm191_vm1, %v38_v19 }
  0xe2   :  { %v105_v20 = vpop.f32.mrf.mxu0  ;;  %v176_v21 = vpop.f32.mrf.mxu1 }
  0xe3   :  { %v180_v22 = vmul.f32 0.03125, %v105_v20  ;;  %v181_v23 = vmul.f32 0.03125, %v176_v21 }
  0xe4   :  { %v449_v24 = vpop.f32.mrf.mxu0  ;;  %v484_v25 = vpop.f32.mrf.mxu1 }
  0xe5   :  { %v182_v26 = vmul.f32 %v180_v22, %v180_v22  ;;  %488 = vmatmul.mubr.msk.f32.vlgmr.msra.gmra.mxu0 %vm187_vm2, %v180_v22 }
  0xe7   :  { %v183_v27 = vsub.f32 %v181_v23, %v182_v26 }
  0xe9   :  { %v184_v28 = vmax.f32 %v183_v27, 0.0 }
  0xeb   :  { %v185_v29 = vadd.f32 1e-05, %v184_v28 }
  0xed   :  { %498 = vrsqrt.f32 %v185_v29 }
  0xfa   :  { %v499_v30 = vpop.eup %498 }
  0xfb   :  { %493 = vmatmul.mubr.msk.f32.vlgmr.msra.gmra.mxu1 %vm187_vm2, %v499_v30 }
 0x1a5   :  { %v261_v31 = vpop.f32.mrf.mxu0 }
 0x1a6   :  { %v340_v35 = vsub.f32 %v21_v16, %v261_v31 }
 0x1a7   :  { %v489_v32 = vpop.f32.mrf.mxu0 }
 0x1bb   :  { %v334_v34 = vpop.f32.mrf.mxu1 }
 0x1bc   :  { %v347_v36 = vmul.f32 %v375_v33, %v334_v34 }
 0x1bd   :  { %v494_v37 = vpop.f32.mrf.mxu1 }
 0x1be   :  { %v348_v39 = vmul.f32 %v347_v36, %v340_v35 }
 0x1c0   :  { %v355_v40 = vadd.f32 %v376_v38, %v348_v39 }
 0x1c2   :  { %356 = vst [vmem:[#allocation2] sm:$0xf] %v355_v40 }
 0x1c3   :  { %511 = shalt.err (!%p508_p4)
}
 0x1c4   :  { %366 = dma.vmem_to_hbm [thread:$0]  %s364_s6, 64, %s661_s5, [#allocation3]  }
 0x1c5   :  { %520 = dma.done.wait [#allocation3], 64  }
 0x1c6   :  { %521 = vsyncadd [#allocation3], 4294967232 }
 0x1c7   :  { %370 = vsyncpa [#allocation3], 1 }

</bundles_post_ra>
